<compile_context>
chip_gen: v7x
topology: tpu7x:2x2x1
jax: 0.10.0
libtpu: 0.0.40
codegen_flags: <defaults>
</compile_context>

<pallas_src>
import functools

import jax
import jax.numpy as jnp
import numpy as np
from jax.experimental import pallas as pl
from jax.experimental.pallas import tpu as pltpu

_NEG = -1e30  # additive mask for invalid (time, channel) positions (needs f32 acc)


def _round_up(x, m):
    return ((x + m - 1) // m) * m


def _conv_fused_kernel(x_ref, w_ref, b_ref, mask_ref, o_ref, *, s_pad, fs_max):
    # x_ref   : [block_n * s_pad, D]  compute dtype (bf16 or f32), flattened rows
    # w_ref   : [fs_max, D, c_pad]    compute dtype, per-shift fused weight slabs
    # b_ref   : [1, c_pad]            f32, fused bias
    # mask_ref: [s_pad, c_pad]        f32, 0 where (t, channel) valid, -1e30 else
    # o_ref   : [block_n, c_pad]      f32, relu(max_t conv + b), lane-dense
    rows, d = x_ref.shape
    c_pad = o_ref.shape[1]
    block_n = rows // s_pad

    x = x_ref[...]  # single VMEM load, reused for every shift

    # Shift-accumulate convolution: shift the *input* (review item #1), not the
    # f32 result.  Shift-k rows that cross a sentence boundary / the slab end
    # only ever contribute to masked time positions or zero weight columns, so
    # semantics are unchanged (requires s_pad >= seq_len, asserted by caller).
    acc = jnp.dot(x, w_ref[0], preferred_element_type=jnp.float32)
    if fs_max > 1:
        xf = x.astype(jnp.float32)  # widen once (no-op on the f32 parity path)
        for k in range(1, fs_max):
            shifted = jnp.concatenate(
                [xf[k:, :], jnp.zeros((k, d), jnp.float32)], axis=0)
            acc = acc + jnp.dot(shifted.astype(x.dtype), w_ref[k],
                                preferred_element_type=jnp.float32)
    # TODO(synk): fold the fs_max matmuls into one K=fs_max*D im2col matmul once
    # unaligned lane concatenation of D(<128)-wide bf16 pieces is verified to
    # lower on the target Mosaic version (review item #2).

    # Masked max over time (per sentence), then bias + ReLU on the small tile.
    # f32 accumulation keeps (-1e30 + finite score) far below any valid score.
    s = acc.reshape(block_n, s_pad, c_pad) + mask_ref[...][None, :, :]
    m = jnp.max(s, axis=1)                            # [block_n, c_pad]
    o_ref[...] = jnp.maximum(m + b_ref[...], 0.0)


def _pick_block_n(n, s_pad, d, c_pad, fs_max):
    """VMEM-aware block size over the flattened sentence dimension."""
    del fs_max  # only one shifted piece (+ its narrow cast) is live at a time
    d_lanes = _round_up(d, 128)  # physical lane footprint of a [rows, D] tile
    # Live bytes per flattened row inside one grid step (conservative):
    #   input, double-buffered (worst case f32)     : 2 * 4 * d_lanes
    #   f32 widened copy of the input               : 4 * d_lanes
    #   f32 shifted piece(s) + narrow cast          : (2*4 + 2) * d_lanes
    #   f32 acc + matmul result + mask-add temp     : 3 * 4 * c_pad
    per_row = d_lanes * (8 + 4 + 10) + c_pad * 12
    per_sentence = s_pad * per_row + 2 * 4 * c_pad   # + double-buffered out row
    budget = 18 * 1024 * 1024   # <= ~20 MiB/step: safe on v7x, roomy on v5e/v6e
    bn = (budget // max(per_sentence, 1)) // 8 * 8
    bn = max(8, min(1024, bn))
    # Keep >= 2 grid steps so dimension_semantics=("parallel",) can shard the
    # batch across v7x's two TensorCores (no-op on single-TC v5e/v6e).
    bn = min(bn, max(8, _round_up(-(-n // 2), 8)))
    return min(bn, max(8, _round_up(n, 8)))


@functools.partial(jax.jit, static_argnames=("filter_sizes", "num_feature_maps"))
def _conv_encoder_impl(x, w_fused, b_fused, *, filter_sizes, num_feature_maps):
    filter_sizes = tuple(filter_sizes)
    C = num_feature_maps
    fs_max = max(filter_sizes)
    c_total = C * len(filter_sizes)
    fs_all, D, c_pad = w_fused.shape
    compute_dtype = w_fused.dtype

    if x.ndim == 4:
        batch, num_sentence, seq_len, d_in = x.shape
        n = batch * num_sentence
    else:
        batch, seq_len, d_in = x.shape
        n = batch
    if d_in != D:
        raise ValueError(f"input word_dim {d_in} != weight word_dim {D}")
    if seq_len < fs_max:
        # PyTorch's Conv1d would also fail here (non-positive output length).
        raise ValueError(f"seq_len={seq_len} < max filter size {fs_max}")

    # Time padded only to a sublane multiple; the shift/mask argument requires
    # s_pad >= seq_len (valid positions never read past their own sentence).
    s_pad = _round_up(seq_len, 8)
    assert s_pad >= seq_len and s_pad % 8 == 0
    block_n = _pick_block_n(n, s_pad, D, c_pad, fs_max)
    n_pad = _round_up(n, block_n)

    # Pad (sentences + time) and cast in ONE fused XLA pass under jit, then
    # flatten to the 2-D row slab the kernel streams (review item #3).
    x_flat = x.reshape(n, seq_len, D)
    x_p = jnp.zeros((n_pad, s_pad, D), compute_dtype)
    x_p = x_p.at[:n, :seq_len, :].set(x_flat.astype(compute_dtype))
    x2 = x_p.reshape(n_pad * s_pad, D)

    # Per-(time, channel) validity mask: t is a real conv output for filter fs
    # iff t <= seq_len - fs.  Built in numpy -> constant-folded under jit.
    mask_np = np.zeros((s_pad, c_pad), np.float32)
    t_idx = np.arange(s_pad)[:, None]
    for j, fs in enumerate(filter_sizes):
        lo = j * C
        mask_np[:, lo:lo + C] = np.where(t_idx <= (seq_len - fs), 0.0, _NEG)
    mask_np[:, c_total:] = _NEG          # padded channel columns (sliced off)
    mask = jnp.asarray(mask_np)

    grid = (n_pad // block_n,)
    kernel = functools.partial(_conv_fused_kernel, s_pad=s_pad, fs_max=fs_max)
    out = pl.pallas_call(
        kernel,
        out_shape=jax.ShapeDtypeStruct((n_pad, c_pad), jnp.float32),
        grid_spec=pltpu.PrefetchScalarGridSpec(
            num_scalar_prefetch=0,
            grid=grid,
            in_specs=[
                pl.BlockSpec((block_n * s_pad, D), lambda i: (i, 0)),
                # w / b / mask have constant index maps (fetched once by the
                # pipeline); they total only a few tens of KiB of VMEM.
                pl.BlockSpec((fs_all, D, c_pad), lambda i: (0, 0, 0)),
                pl.BlockSpec((1, c_pad), lambda i: (0, 0)),
                pl.BlockSpec((s_pad, c_pad), lambda i: (0, 0)),
            ],
            out_specs=pl.BlockSpec((block_n, c_pad), lambda i: (i, 0)),
        ),
        compiler_params=pltpu.CompilerParams(
            dimension_semantics=("parallel",),
            vmem_limit_bytes=48 * 1024 * 1024,
        ),
    )(x2, w_fused, b_fused, mask)

    out = out[:n, :c_total]
    if x.ndim == 4:
        return out.reshape(batch, num_sentence, c_total)
    return out.reshape(batch, c_total)


def build_fused_params(params, opt, input_dim=None, compute_dtype=jnp.bfloat16):
    """Precompute the fused per-shift weight slab + bias once (review item #10).

    params[fs] = (w [C, 1, fs*D] in PyTorch Conv1d layout, b [C]).  Column block
    j of the slab holds filter_sizes[j]'s channels; W[k] holds each filter's
    k-th word slice (zero for k >= fs), so one shift-accumulate pass covers all
    filter sizes.  compute_dtype selects the MXU input precision: bfloat16 for
    speed (default), float32 for parity testing against the f32 reference.
    """
    filter_sizes = tuple(opt["filter_sizes"])
    C = opt["num_feature_maps"]
    D = input_dim or opt["word_dim"]
    fs_max = max(filter_sizes)
    c_pad = _round_up(C * len(filter_sizes), 128)

    w_all = np.zeros((fs_max, D, c_pad), np.float32)
    b_all = np.zeros((1, c_pad), np.float32)
    for j, fs in enumerate(filter_sizes):
        w_fs, b_fs = params[fs]
        w_np = np.asarray(w_fs, np.float32).reshape(C, fs, D)  # word-major flatten
        lo = j * C
        for k in range(fs):
            w_all[k, :, lo:lo + C] = w_np[:, k, :].T
        b_all[0, lo:lo + C] = np.asarray(b_fs, np.float32)

    return {
        "w": jnp.asarray(w_all, compute_dtype),
        "b": jnp.asarray(b_all, jnp.float32),
        "filter_sizes": filter_sizes,
        "num_feature_maps": C,
    }


def conv_encoder_forward(x, fused):
    """x: [batch, num_sentence, seq_len, D] (mode='s') or [batch, seq_len, D]."""
    return _conv_encoder_impl(
        x, fused["w"], fused["b"],
        filter_sizes=fused["filter_sizes"],
        num_feature_maps=fused["num_feature_maps"])


def conv_encoder_reference(x, params, opt):
    """Plain-JAX f32 reference mirroring the PyTorch forward (verification only)."""
    if x.ndim == 4:
        batch, num_sentence, seq_len, D = x.shape
        n = batch * num_sentence
    else:
        batch, seq_len, D = x.shape
        n, num_sentence = batch, None
    x_flat = x.reshape(n, seq_len, D)
    outs = []
    for fs in opt["filter_sizes"]:
        w, b = params[fs]
        C = w.shape[0]
        t_out = seq_len - fs + 1
        windows = jnp.stack(
            [x_flat[:, t:t + fs, :].reshape(n, fs * D) for t in range(t_out)], axis=1)
        s = jnp.einsum("ntk,ck->ntc", windows, w.reshape(C, fs * D)) + b[None, None, :]
        outs.append(jnp.max(jax.nn.relu(s), axis=1))
    out = jnp.concatenate(outs, axis=-1)
    if x.ndim == 4:
        return out.reshape(batch, num_sentence, -1)
    return out.reshape(batch, -1)


def init_params(key, opt, input_dim):
    """Deterministic PyTorch-style Conv1d init: U(-1/sqrt(fan_in), 1/sqrt(fan_in))."""
    params = {}
    C = opt["num_feature_maps"]
    for fs in opt["filter_sizes"]:
        key, kw, kb = jax.random.split(key, 3)
        ksz = input_dim * fs
        bound = 1.0 / jnp.sqrt(jnp.asarray(ksz, jnp.float32))
        w = jax.random.uniform(kw, (C, 1, ksz), jnp.float32, -bound, bound)
        b = jax.random.uniform(kb, (C,), jnp.float32, -bound, bound)
        params[fs] = (w, b)
    return params


if __name__ == "__main__":
    opt = {"word_dim": 32, "num_feature_maps": 16, "filter_sizes": [1, 2, 3]}
    batch, num_sentence, seq_len, D = 2, 3, 8, opt["word_dim"]
    c_total = opt["num_feature_maps"] * len(opt["filter_sizes"])

    key = jax.random.PRNGKey(0)
    key, kx = jax.random.split(key)
    x = jax.random.normal(kx, (batch, num_sentence, seq_len, D), jnp.float32)
    params = init_params(key, opt, D)

    # Main path: bf16 inputs / weights, f32 MXU accumulation.
    fused_bf16 = build_fused_params(params, opt, D)
    out = jax.block_until_ready(conv_encoder_forward(x, fused_bf16))
    ref = conv_encoder_reference(x, params, opt)
    assert out.shape == (batch, num_sentence, c_total), f"bad shape {out.shape}"
    max_err = jnp.max(jnp.abs(out - ref))
    assert jnp.allclose(out, ref, atol=5e-2, rtol=5e-2), \
        f"bf16 path mismatch vs reference (max err {max_err})"

    # f32 parity path (explicit precision choice, per review correctness note).
    fused_f32 = build_fused_params(params, opt, D, compute_dtype=jnp.float32)
    out_f32 = jax.block_until_ready(conv_encoder_forward(x, fused_f32))
    max_err_f32 = jnp.max(jnp.abs(out_f32 - ref))
    assert jnp.allclose(out_f32, ref, atol=1e-2, rtol=1e-2), \
        f"f32 path mismatch vs reference (max err {max_err_f32})"

    # mode != 's' path: [batch, seq_len, D] input.
    x3 = x[:, 0]
    out3 = jax.block_until_ready(conv_encoder_forward(x3, fused_bf16))
    ref3 = conv_encoder_reference(x3, params, opt)
    assert out3.shape == (batch, c_total), f"bad shape {out3.shape}"
    assert jnp.allclose(out3, ref3, atol=5e-2, rtol=5e-2), "3-D path mismatch"

    print("KERNEL_OK")
</pallas_src>

<mosaic_0001>
module attributes {stable_mosaic.version = 11 : i64} {
  func.func @_conv_fused_kernel(%arg0: i32, %arg1: memref<64x32xbf16, #tpu.memory_space<vmem>>, %arg2: memref<3x32x128xbf16, #tpu.memory_space<vmem>>, %arg3: memref<1x128xf32, #tpu.memory_space<vmem>>, %arg4: memref<8x128xf32, #tpu.memory_space<vmem>>, %arg5: memref<8x128xf32, #tpu.memory_space<vmem>>) attributes {dimension_semantics = [#tpu.dimension_semantics<parallel>], iteration_bounds = array<i64: 1>, scalar_prefetch = 0 : i64, scratch_operands = 0 : i64, tpu.core_type = #tpu.core_type<tc>, window_params = [{transform_indices = @transform_0, window_bounds = array<i64: 64, 32>}, {pipeline_mode = #tpu.pipeline_mode<synchronous>, transform_indices = @transform_1, window_bounds = array<i64: 3, 32, 128>}, {pipeline_mode = #tpu.pipeline_mode<synchronous>, transform_indices = @transform_2, window_bounds = array<i64: 1, 128>}, {pipeline_mode = #tpu.pipeline_mode<synchronous>, transform_indices = @transform_3, window_bounds = array<i64: 8, 128>}, {transform_indices = @transform_4, window_bounds = array<i64: 8, 128>}]} {
    %c0 = arith.constant 0 : index
    %c0_0 = arith.constant 0 : index
    %0 = vector.load %arg1[%c0, %c0_0] : memref<64x32xbf16, #tpu.memory_space<vmem>>, vector<64x32xbf16>
    %c0_1 = arith.constant 0 : index
    %c0_2 = arith.constant 0 : index
    %c0_3 = arith.constant 0 : index
    %1 = vector.load %arg2[%c0_1, %c0_2, %c0_3] : memref<3x32x128xbf16, #tpu.memory_space<vmem>>, vector<1x32x128xbf16>
    %2 = vector.shape_cast %1 : vector<1x32x128xbf16> to vector<32x128xbf16>
    %cst = arith.constant dense<0.000000e+00> : vector<64x128xf32>
    %3 = tpu.matmul %0, %2, %cst {dimension_numbers = #tpu.dot_dimension_numbers<[1], [0], [0], [1], [0, 0, 1, 1], [], []>} : vector<64x32xbf16>, vector<32x128xbf16>, vector<64x128xf32> -> vector<64x128xf32>
    %4 = arith.extf %0 : vector<64x32xbf16> to vector<64x32xf32>
    %5 = vector.extract_strided_slice %4 {offsets = [1, 0], sizes = [63, 32], strides = [1, 1]} : vector<64x32xf32> to vector<63x32xf32>
    %cst_4 = arith.constant 0.000000e+00 : f32
    %6 = vector.broadcast %cst_4 : f32 to vector<1x32xf32>
    %7 = tpu.concatenate %5, %6 in 0 : vector<63x32xf32>, vector<1x32xf32> -> vector<64x32xf32>
    %8 = arith.truncf %7 : vector<64x32xf32> to vector<64x32xbf16>
    %c1 = arith.constant 1 : index
    %c0_5 = arith.constant 0 : index
    %c0_6 = arith.constant 0 : index
    %9 = vector.load %arg2[%c1, %c0_5, %c0_6] : memref<3x32x128xbf16, #tpu.memory_space<vmem>>, vector<1x32x128xbf16>
    %10 = vector.shape_cast %9 : vector<1x32x128xbf16> to vector<32x128xbf16>
    %cst_7 = arith.constant dense<0.000000e+00> : vector<64x128xf32>
    %11 = tpu.matmul %8, %10, %cst_7 {dimension_numbers = #tpu.dot_dimension_numbers<[1], [0], [0], [1], [0, 0, 1, 1], [], []>} : vector<64x32xbf16>, vector<32x128xbf16>, vector<64x128xf32> -> vector<64x128xf32>
    %12 = arith.addf %3, %11 : vector<64x128xf32>
    %13 = vector.extract_strided_slice %4 {offsets = [2, 0], sizes = [62, 32], strides = [1, 1]} : vector<64x32xf32> to vector<62x32xf32>
    %cst_8 = arith.constant 0.000000e+00 : f32
    %14 = vector.broadcast %cst_8 : f32 to vector<2x32xf32>
    %15 = tpu.concatenate %13, %14 in 0 : vector<62x32xf32>, vector<2x32xf32> -> vector<64x32xf32>
    %16 = arith.truncf %15 : vector<64x32xf32> to vector<64x32xbf16>
    %c2 = arith.constant 2 : index
    %c0_9 = arith.constant 0 : index
    %c0_10 = arith.constant 0 : index
    %17 = vector.load %arg2[%c2, %c0_9, %c0_10] : memref<3x32x128xbf16, #tpu.memory_space<vmem>>, vector<1x32x128xbf16>
    %18 = vector.shape_cast %17 : vector<1x32x128xbf16> to vector<32x128xbf16>
    %cst_11 = arith.constant dense<0.000000e+00> : vector<64x128xf32>
    %19 = tpu.matmul %16, %18, %cst_11 {dimension_numbers = #tpu.dot_dimension_numbers<[1], [0], [0], [1], [0, 0, 1, 1], [], []>} : vector<64x32xbf16>, vector<32x128xbf16>, vector<64x128xf32> -> vector<64x128xf32>
    %20 = arith.addf %12, %19 : vector<64x128xf32>
    %21 = vector.shape_cast %20 : vector<64x128xf32> to vector<8x8x128xf32>
    %c0_12 = arith.constant 0 : index
    %c0_13 = arith.constant 0 : index
    %22 = vector.load %arg4[%c0_12, %c0_13] : memref<8x128xf32, #tpu.memory_space<vmem>>, vector<8x128xf32>
    %23 = vector.shape_cast %22 : vector<8x128xf32> to vector<1x8x128xf32>
    %24 = vector.broadcast %23 : vector<1x8x128xf32> to vector<8x8x128xf32>
    %25 = arith.addf %21, %24 : vector<8x8x128xf32>
    %cst_14 = arith.constant dense<0xFF800000> : vector<8x128xf32>
    %26 = vector.multi_reduction <maximumf>, %25, %cst_14 [1] : vector<8x8x128xf32> to vector<8x128xf32>
    %c0_15 = arith.constant 0 : index
    %c0_16 = arith.constant 0 : index
    %27 = vector.load %arg3[%c0_15, %c0_16] : memref<1x128xf32, #tpu.memory_space<vmem>>, vector<1x128xf32>
    %28 = vector.broadcast %27 : vector<1x128xf32> to vector<8x128xf32>
    %29 = arith.addf %26, %28 : vector<8x128xf32>
    %cst_17 = arith.constant 0.000000e+00 : f32
    %30 = vector.broadcast %cst_17 : f32 to vector<8x128xf32>
    %31 = arith.maximumf %29, %30 : vector<8x128xf32>
    %c0_18 = arith.constant 0 : index
    %c0_19 = arith.constant 0 : index
    %32 = vector.load %arg5[%c0_18, %c0_19] : memref<8x128xf32, #tpu.memory_space<vmem>>, vector<8x128xf32>
    tpu.vector_store %arg5[%c0_18, %c0_19], %31 {strides = array<i32>} : memref<8x128xf32, #tpu.memory_space<vmem>>, vector<8x128xf32>,
    return
  }
  func.func @transform_0(%arg0: i32) -> (i32, i32) {
    %c0_i32 = arith.constant 0 : i32
    %c0_i32_0 = arith.constant 0 : i32
    return %arg0, %c0_i32 : i32, i32
  }
  func.func @transform_1(%arg0: i32) -> (i32, i32, i32) {
    %c0_i32 = arith.constant 0 : i32
    %c0_i32_0 = arith.constant 0 : i32
    %c0_i32_1 = arith.constant 0 : i32
    %c0_i32_2 = arith.constant 0 : i32
    return %c0_i32, %c0_i32_0, %c0_i32_1 : i32, i32, i32
  }
  func.func @transform_2(%arg0: i32) -> (i32, i32) {
    %c0_i32 = arith.constant 0 : i32
    %c0_i32_0 = arith.constant 0 : i32
    %c0_i32_1 = arith.constant 0 : i32
    return %c0_i32, %c0_i32_0 : i32, i32
  }
  func.func @transform_3(%arg0: i32) -> (i32, i32) {
    %c0_i32 = arith.constant 0 : i32
    %c0_i32_0 = arith.constant 0 : i32
    %c0_i32_1 = arith.constant 0 : i32
    return %c0_i32, %c0_i32_0 : i32, i32
  }
  func.func @transform_4(%arg0: i32) -> (i32, i32) {
    %c0_i32 = arith.constant 0 : i32
    %c0_i32_0 = arith.constant 0 : i32
    return %arg0, %c0_i32 : i32, i32
  }
}

</mosaic_0001>

<bundles_post_ra>
// kernel: _conv_encoder_impl.1
= control target key start
LH: loop header
LB: loop body
LE: loop exit
PB: predicated region body
PF: predicated region fallthrough
CT: control target
= control target key end

     0   :  { %vm46_vm0 = vcmask 1046528   ;;  %vm92_vm1 = vcmask 261120   ;;  %vm279_vm2 = vcmask 1045504   ;;  %vm499_vm3 = vcmask 1041409   ;;  %s747_s1 = inlined_call_operand.vmem [shape: bf16[3,32,128], index: 1, kind: input, shape index: {}]   ;;  %s748_s0 = inlined_call_operand.vmem [shape: bf16[64,32], index: 0, kind: input, shape index: {}]   ;;  %s749_s3 = inlined_call_operand.vmem [shape: f32[8,128], index: 3, kind: input, shape index: {}]   ;;  %s750_s2 = inlined_call_operand.vmem [shape: f32[1,128], index: 2, kind: input, shape index: {}]   ;;  %s751_s4 = inlined_call_operand.vmem [shape: f32[8,128], index: 4, kind: output, shape index: {}]  }
   0x1   :  { %v630_v0 = vld [vmem:[%s747_s1 + $0x10] sm:$0xff]   ;;  %v631_v1 = vld [vmem:[%s747_s1] sm:$0xff]   ;;  %v632_v2 = vld [vmem:[%s747_s1 + $0x18] sm:$0xff]   ;;  %vm502_vm4 = vcmask 1042434   ;;  %vm505_vm5 = vcmask 1043459   ;;  %vm508_vm6 = vcmask 1044484  }
   0x2   :  { %574 = vmatprep.subr.bf16.mxu1 %v630_v0  ;;  %586 = vmatprep.subr.bf16.mxu0 %v631_v1  ;;  %v681_v3 = vld [vmem:[%s747_s1 + $0x8] sm:$0xff]   ;;  %v18_v4 = vld [vmem:[%s748_s0] sm:$0xff]   ;;  %v692_v6 = vld [vmem:[%s748_s0 + $0x10] sm:$0xff]   ;;  %vm511_vm7 = vcmask 1045509   ;;  %vm514_vm8 = vcmask 1046534   ;;  %vm517_vm9 = vcmask 1047559  }
   0x3   :  { %575 = vmatpush3.bf16.msra.mxu1 %v630_v0  ;;  %587 = vmatpush3.bf16.msra.mxu0 %v631_v1  ;;  %v20_v5 = vld [vmem:[%s748_s0 + $0x8] sm:$0xff]   ;;  %v30_v7 = vunpack.c.l.bf16 %v18_v4  ;;  %v31_v8 = vunpack.c.h.bf16 %v18_v4  ;;  %v636_v10 = vld [vmem:[%s747_s1 + $0x20] sm:$0xff]   ;;  %v34_v12 = vunpack.c.l.bf16 %v692_v6  ;;  %v35_v13 = vunpack.c.h.bf16 %v692_v6  ;;  %v24_v18 = vld [vmem:[%s748_s0 + $0x18] sm:$0xff]  }
   0x4   :  { %576 = vmatprep.subr.bf16.mxu1 %v632_v2  ;;  %588 = vmatprep.subr.bf16.mxu0 %v681_v3  ;;  %v32_v9 = vunpack.c.l.bf16 %v20_v5  ;;  %v33_v11 = vunpack.c.h.bf16 %v20_v5  ;;  %v637_v25 = vld [vmem:[%s747_s1 + $0x28] sm:$0xff]   ;;  %v36_v29 = vunpack.c.l.bf16 %v24_v18  ;;  %v37_v33 = vunpack.c.h.bf16 %v24_v18  ;;  %v410_v63 = vld [vmem:[%s749_s3] sm:$0xff] }
   0x5   :  { %v47_v14 = vrot.slane %v30_v7, 1  ;;  %v48_v15 = vrot.slane %v31_v8, 1  ;;  %v280_v17 = vrot.slane %v30_v7, 2  ;;  %590 = vmatprep.mubr.msk.bf16.mxu0 %vm92_vm1, %v18_v4  ;;  %v281_v19 = vrot.slane %v31_v8, 2 }
   0x6   :  { %v50_v16 = vrot.slane %v32_v9, 1  ;;  %v283_v20 = vrot.slane %v32_v9, 2  ;;  %v52_v21 = vrot.slane %v33_v11, 1  ;;  %v54_v22 = vrot.slane %v34_v12, 1 }
   0x7   :  { %577 = vmatpush3.bf16.msra.mxu1 %v632_v2  ;;  %589 = vmatpush3.bf16.msra.mxu0 %v681_v3  ;;  %v49_v23 = vsel %vm46_vm0, %v47_v14, %v48_v15  ;;  %v285_v31 = vrot.slane %v33_v11, 2  ;;  %v56_v32 = vrot.slane %v35_v13, 1  ;;  %v287_v34 = vrot.slane %v34_v12, 2 }
   0x8   :  { %610 = vmatprep.subr.bf16.mxu1 %v631_v1  ;;  %v51_v24 = vsel %vm46_vm0, %v48_v15, %v50_v16  ;;  %598 = vmatprep.subr.bf16.mxu0 %v636_v10  ;;  %v53_v27 = vsel %vm46_vm0, %v50_v16, %v52_v21  ;;  %v55_v28 = vsel %vm46_vm0, %v52_v21, %v54_v22  ;;  %v58_v35 = vrot.slane %v36_v29, 1 }
   0x9   :  { %v71_v26 = vpack.c.bf16 %v51_v24, %v49_v23  ;;  %v72_v30 = vpack.c.bf16 %v55_v28, %v53_v27  ;;  %v282_v36 = vsel %vm279_vm2, %v280_v17, %v281_v19  ;;  %v284_v37 = vsel %vm279_vm2, %v281_v19, %v283_v20 }
   0xa   :  { %591 = vmatmul.mubr.msk.bf16.vlgmr.msra.gmra.mrb[0].mxu0 %vm92_vm1, %v20_v5  ;;  %v57_v38 = vsel %vm46_vm0, %v54_v22, %v56_v32  ;;  %v60_v39 = vrot.slane %v37_v33, 1  ;;  %v304_v40 = vpack.c.bf16 %v284_v37, %v282_v36  ;;  %v59_v41 = vsel %vm46_vm0, %v56_v32, %v58_v35 }
   0xb   :  { %578 = vmatprep.mubr.msk.bf16.mxu1 %vm92_vm1, %v71_v26  ;;  %599 = vmatpush3.bf16.msra.mxu0 %v636_v10  ;;  %v289_v42 = vrot.slane %v35_v13, 2  ;;  %v73_v43 = vpack.c.bf16 %v59_v41, %v57_v38  ;;  %v291_v46 = vrot.slane %v36_v29, 2  ;;  %v286_v47 = vsel %vm279_vm2, %v283_v20, %v285_v31 }
   0xc   :  { %579 = vmatmul.mubr.msk.bf16.vlgmr.msra.gmra.mrb[0].mxu1 %vm92_vm1, %v72_v30  ;;  %600 = vmatprep.subr.bf16.mxu0 %v637_v25  ;;  %v61_v44 = vsel %vm46_vm0, %v58_v35, %v60_v39  ;;  %v70_v45 = vsel %vm46_vm0, %v60_v39, 0.0  ;;  %v288_v48 = vsel %vm279_vm2, %v285_v31, %v287_v34  ;;  %v293_v54 = vrot.slane %v37_v33, 2  ;;  %v555_v39 = vld [vmem:[%s750_s2] ss:$0 sm:$0xff] }
   0xd   :  { %612 = vmatpush3.bf16.msra.mxu1 %v631_v1  ;;  %602 = vmatprep.mubr.msk.bf16.mxu0 %vm92_vm1, %v304_v40  ;;  %v74_v49 = vpack.c.bf16 %v70_v45, %v61_v44  ;;  %v290_v50 = vsel %vm279_vm2, %v287_v34, %v289_v42  ;;  %v292_v51 = vsel %vm279_vm2, %v289_v42, %v291_v46 }
   0xe   :  { %611 = vmatprep.subr.bf16.mxu1 %v681_v3  ;;  %582 = vmatprep.mubr.msk.bf16.mxu1 %vm92_vm1, %v73_v43  ;;  %v305_v52 = vpack.c.bf16 %v288_v48, %v286_v47  ;;  %v306_v53 = vpack.c.bf16 %v292_v51, %v290_v50  ;;  %v294_v55 = vsel %vm279_vm2, %v291_v46, %v293_v54  ;;  %v303_v56 = vsel %vm279_vm2, %v293_v54, 0.0 }
   0xf   :  { %601 = vmatpush3.bf16.msra.mxu0 %v637_v25  ;;  %v307_v57 = vpack.c.bf16 %v303_v56, %v294_v55 }
  0x11   :  { %613 = vmatpush3.bf16.msra.mxu1 %v681_v3 }
  0x14   :  { %583 = vmatmul.mubr.msk.bf16.gmra.mrb[4].mxu1 %vm92_vm1, %v74_v49 }
  0x15   :  { %594 = vmatprep.mubr.msk.bf16.mxu1 %vm92_vm1, %v692_v6 }
  0x16   :  { %603 = vmatmul.mubr.msk.bf16.vlgmr.msra.gmra.mrb[0].mxu0 %vm92_vm1, %v305_v52 }
  0x17   :  { %606 = vmatprep.mubr.msk.bf16.mxu0 %vm92_vm1, %v306_v53 }
  0x1e   :  { %607 = vmatmul.mubr.msk.bf16.gmra.mrb[4].mxu0 %vm92_vm1, %v307_v57 }
  0x20   :  { %595 = vmatmul.mubr.msk.bf16.vlgmr.msra.gmra.mrb[4].mxu1 %vm92_vm1, %v24_v18 }
  0xdf   :  { %v580_v58 = vpop.f32.mrb[0].mxu1 }
  0xe0   :  { %v139_v59 = vpop.f32.mrb[1].mxu1 }
  0xe1   :  { %v581_v60 = vpop.f32.mrb[2].mxu1 }
  0xe2   :  { %v142_v61 = vpop.f32.mrb[3].mxu1 }
  0xe9   :  { %v604_v62 = vpop.f32.mrb[0].mxu0 }
  0xea   :  { %v614_v0 = vadd.f32 %v604_v62, %v580_v58  ;;  %v371_v1 = vpop.f32.mrb[1].mxu0 }
  0xeb   :  { %v615_v2 = vadd.f32 %v371_v1, %v139_v59  ;;  %v605_v3 = vpop.f32.mrb[2].mxu0 }
  0xec   :  { %v413_v4 = vadd.f32 %v614_v0, %v410_v63  ;;  %v616_v5 = vadd.f32 %v605_v3, %v581_v60  ;;  %v374_v6 = vpop.f32.mrb[3].mxu0 }
  0xed   :  { %v411_v7 = vadd.f32 %v615_v2, %v410_v63  ;;  %v617_v8 = vadd.f32 %v374_v6, %v142_v61 }
  0xee   :  { %v431_v9 = vrot.slane %v413_v4, 4  ;;  %v414_v10 = vadd.f32 %v616_v5, %v410_v63 }
  0xef   :  { %v419_v11 = vrot.slane %v411_v7, 4  ;;  %v412_v12 = vadd.f32 %v617_v8, %v410_v63 }
  0xf0   :  { %v432_v13 = vmax.f32 %v413_v4, %v431_v9  ;;  %v437_v14 = vrot.slane %v414_v10, 4 }
  0xf1   :  { %v420_v15 = vmax.f32 %v411_v7, %v419_v11  ;;  %v425_v16 = vrot.slane %v412_v12, 4  ;;  %v608_v17 = vpop.f32.mrb[4].mxu0 }
  0xf2   :  { %v433_v18 = vrot.slane %v432_v13, 2  ;;  %v438_v19 = vmax.f32 %v414_v10, %v437_v14  ;;  %v387_v20 = vpop.f32.mrb[5].mxu0 }
  0xf3   :  { %v421_v21 = vrot.slane %v420_v15, 2  ;;  %v426_v22 = vmax.f32 %v412_v12, %v425_v16  ;;  %v596_v23 = vpop.f32.mrb[4].mxu1  ;;  %v609_v24 = vpop.f32.mrb[6].mxu0 }
  0xf4   :  { %v434_v25 = vmax.f32 %v432_v13, %v433_v18  ;;  %v439_v26 = vrot.slane %v438_v19, 2  ;;  %v618_v27 = vadd.f32 %v608_v17, %v596_v23  ;;  %v264_v28 = vpop.f32.mrb[5].mxu1  ;;  %v390_v29 = vpop.f32.mrb[7].mxu0 }
  0xf5   :  { %v422_v30 = vmax.f32 %v420_v15, %v421_v21  ;;  %v427_v31 = vrot.slane %v426_v22, 2  ;;  %v619_v32 = vadd.f32 %v387_v20, %v264_v28  ;;  %v597_v33 = vpop.f32.mrb[6].mxu1 }
  0xf6   :  { %v435_v34 = vrot.slane %v434_v25, 1  ;;  %v440_v35 = vmax.f32 %v438_v19, %v439_v26  ;;  %v417_v36 = vadd.f32 %v618_v27, %v410_v63  ;;  %v620_v37 = vadd.f32 %v609_v24, %v597_v33  ;;  %v267_v38 = vpop.f32.mrb[7].mxu1 }
  0xf7   :  { %v423_v40 = vrot.slane %v422_v30, 1  ;;  %v428_v41 = vmax.f32 %v426_v22, %v427_v31  ;;  %v415_v42 = vadd.f32 %v619_v32, %v410_v63  ;;  %v621_v43 = vadd.f32 %v390_v29, %v267_v38 }
  0xf8   :  { %v436_v44 = vmax.f32 %v434_v25, %v435_v34  ;;  %v441_v45 = vrot.slane %v440_v35, 1  ;;  %v455_v46 = vrot.slane %v417_v36, 4  ;;  %v418_v47 = vadd.f32 %v620_v37, %v410_v63 }
  0xf9   :  { %v424_v48 = vmax.f32 %v422_v30, %v423_v40  ;;  %v429_v49 = vrot.slane %v428_v41, 1  ;;  %v443_v50 = vrot.slane %v415_v42, 4  ;;  %v416_v51 = vadd.f32 %v621_v43, %v410_v63 }
  0xfa   :  { %v476_v52 = vadd.f32 %v555_v39, %v436_v44  ;;  %v442_v53 = vmax.f32 %v440_v35, %v441_v45  ;;  %v456_v54 = vmax.f32 %v417_v36, %v455_v46  ;;  %v461_v55 = vrot.slane %v418_v47, 4 }
  0xfb   :  { %v430_v56 = vmax.f32 %v428_v41, %v429_v49  ;;  %v444_v57 = vmax.f32 %v415_v42, %v443_v50  ;;  %v449_v58 = vrot.slane %v416_v51, 4  ;;  %v474_v62 = vadd.f32 %v555_v39, %v424_v48 }
  0xfc   :  { %v477_v59 = vadd.f32 %v555_v39, %v442_v53  ;;  %v457_v60 = vrot.slane %v456_v54, 2  ;;  %v462_v61 = vmax.f32 %v418_v47, %v461_v55  ;;  %v484_v3 = vmax.f32 %v476_v52, 0.0 }
  0xfd   :  { %v475_v0 = vadd.f32 %v555_v39, %v430_v56  ;;  %v445_v1 = vrot.slane %v444_v57, 2  ;;  %v450_v2 = vmax.f32 %v416_v51, %v449_v58  ;;  %v482_v11 = vmax.f32 %v474_v62, 0.0 }
  0xfe   :  { %v458_v4 = vmax.f32 %v456_v54, %v457_v60  ;;  %v463_v5 = vrot.slane %v462_v61, 2  ;;  %v485_v6 = vmax.f32 %v477_v59, 0.0  ;;  %v501_v15 = vrot.slane %v484_v3, 6 }
  0xff   :  { %v483_v7 = vmax.f32 %v475_v0, 0.0  ;;  %v446_v63 = vmax.f32 %v444_v57, %v445_v1  ;;  %v451_v8 = vrot.slane %v450_v2, 2 }
 0x100   :  { %v459_v9 = vrot.slane %v458_v4, 1  ;;  %v464_v10 = vmax.f32 %v462_v61, %v463_v5  ;;  %v504_v18 = vrot.slane %v485_v6, 5 }
 0x101   :  { %v498_v12 = vrot.slane %v483_v7, 7  ;;  %v447_v13 = vrot.slane %v446_v63, 1  ;;  %v452_v14 = vmax.f32 %v450_v2, %v451_v8 }
 0x102   :  { %v460_v16 = vmax.f32 %v458_v4, %v459_v9  ;;  %v465_v17 = vrot.slane %v464_v10, 1 }
 0x103   :  { %v500_v19 = vsel %vm499_vm3, %v498_v12, %v482_v11  ;;  %v448_v20 = vmax.f32 %v446_v63, %v447_v13  ;;  %v453_v21 = vrot.slane %v452_v14, 1 }
 0x104   :  { %v503_v22 = vsel %vm502_vm4, %v501_v15, %v500_v19  ;;  %v480_v23 = vadd.f32 %v555_v39, %v460_v16  ;;  %v466_v24 = vmax.f32 %v464_v10, %v465_v17 }
 0x105   :  { %v478_v25 = vadd.f32 %v555_v39, %v448_v20  ;;  %v506_v26 = vsel %vm505_vm5, %v504_v18, %v503_v22  ;;  %v454_v27 = vmax.f32 %v452_v14, %v453_v21 }
 0x106   :  { %v481_v28 = vadd.f32 %v555_v39, %v466_v24  ;;  %v488_v31 = vmax.f32 %v480_v23, 0.0 }
 0x107   :  { %v486_v29 = vmax.f32 %v478_v25, 0.0  ;;  %v479_v30 = vadd.f32 %v555_v39, %v454_v27 }
 0x108   :  { %v489_v33 = vmax.f32 %v481_v28, 0.0  ;;  %v513_v37 = vrot.slane %v488_v31, 2 }
 0x109   :  { %v507_v32 = vrot.slane %v486_v29, 4  ;;  %v487_v34 = vmax.f32 %v479_v30, 0.0 }
 0x10a   :  { %v516_v38 = vrot.slane %v489_v33, 1 }
 0x10b   :  { %v509_v35 = vsel %vm508_vm6, %v507_v32, %v506_v26  ;;  %v510_v36 = vrot.slane %v487_v34, 3 }
 0x10d   :  { %v512_v40 = vsel %vm511_vm7, %v510_v36, %v509_v35 }
 0x10e   :  { %v515_v41 = vsel %vm514_vm8, %v513_v37, %v512_v40 }
 0x10f   :  { %v518_v42 = vsel %vm517_vm9, %v516_v38, %v515_v41 }
 0x110   :  { %520 = vst [vmem:[%s751_s4] sm:$0xff] %v518_v42 }

</bundles_post_ra>
